<compile_context>
chip_gen: v6e
topology: v6e:2x2x1
jax: 0.10.0
libtpu: 0.0.40
codegen_flags: <defaults>
</compile_context>

<pallas_src>
import jax
import jax.numpy as jnp
from jax.experimental import pallas as pl
from jax.experimental.pallas import tpu as pltpu


def _expanding_kernel(x_ref, w_ref, b_ref, a_ref, o_ref):
    """1x1 conv (contraction over Cin) + bias + single-parameter PReLU.

    x_ref : (Nb, Cin, TL)  VMEM   spatial tile for Nb images, Cin on sublanes
    w_ref : (Cout, Cin)    VMEM   conv weight (constant block, fetched once)
    b_ref : (Cout, 1)      VMEM   conv bias
    a_ref : (1, 1)         SMEM   PReLU slope (scalar path, no vreg wasted)
    o_ref : (Nb, Cout, TL) VMEM   lane-dense output tile (TL % 128 == 0)
    """
    nb, cout, tl = o_ref.shape
    cin = x_ref.shape[1]
    x = x_ref[...]
    w = w_ref[...]
    b = b_ref[...]

    if cin <= 16:
        # Tiny contraction: keep it on the VPU as `cin` unrolled multiply-adds
        # over lane-dense rows.  The MXU would be <4% utilized at K=Cin and the
        # kernel is HBM-bandwidth bound anyway (threshold is a tuning knob).
        acc = jnp.broadcast_to(b[None, :, :], (nb, cout, tl)).astype(jnp.float32)
        for c in range(cin):  # static unroll, cin is a trace-time constant
            acc = acc + w[:, c][None, :, None] * x[:, c, :][:, None, :]
    else:
        # Larger channel counts: batched matmul on the MXU.
        acc = jnp.einsum("oc,ncl->nol", w, x,
                         preferred_element_type=jnp.float32) + b[None, :, :]

    a = a_ref[0, 0]
    o_ref[...] = jnp.where(acc > 0, acc, a * acc).astype(o_ref.dtype)


def _lane_tile_candidates(hw_pad):
    """All 128-multiples that divide hw_pad (hw_pad itself is a 128-multiple)."""
    nblk = hw_pad // 128
    return [128 * d for d in range(1, nblk + 1) if nblk % d == 0]


def _plan_tiling(N, Cin, Cout, hw_pad, *, bytes_per_elem=4,
                 per_step_budget=4 << 20, max_lane_tile=32768):
    """Pick (Nb, TL).  Bytes moved per grid step (in+out) ~=
    Nb*(Cin+Cout)*TL*bytes_per_elem; we target ~4 MiB/step so per-step
    pipeline overhead (~0.35 us) is amortized and DMA blocks are large and
    lane-dense, while the double-buffered footprint (~2x that) stays well
    under the smallest scoped-VMEM default (16 MiB v5e, 32 MiB v6e/v7x)."""
    row_bytes = (Cin + Cout) * bytes_per_elem   # bytes per lane per image

    # 1) largest lane tile that divides the (padded) spatial extent and fits
    cands = _lane_tile_candidates(hw_pad)
    fitting = [t for t in cands
               if t <= max_lane_tile and row_bytes * t <= per_step_budget]
    tl = max(fitting) if fitting else 128

    # 2) batch several images per grid step when the feature map is small --
    #    the only way to amortize per-step overhead for small H*W layers.
    nb = 1
    for d in range(1, N + 1):
        if N % d == 0 and d * row_bytes * tl <= per_step_budget:
            nb = max(nb, d)

    # 3) keep >=2 grid cells when possible so v7x's two TensorCores both get
    #    work (no-op on single-TC v5e/v6e).
    if (N // nb) * (hw_pad // tl) < 2:
        if N > 1:
            nb = max(d for d in range(1, N // 2 + 1) if N % d == 0)
        else:
            smaller = [t for t in cands
                       if t <= max_lane_tile and hw_pad // t >= 2]
            if smaller:
                tl = max(smaller)
    return nb, tl


def expanding_forward(x_nchw, weight, bias, alpha):
    """1x1 Conv2d(out2 -> out1, bias=True) + PReLU, matching `expanding`.

    x_nchw : (N, Cin, H, W) float32
    weight : (Cout, Cin, 1, 1) float32   (PyTorch conv-weight layout)
    bias   : (Cout,) float32
    alpha  : scalar float32 (single-parameter PReLU slope)
    returns: (N, Cout, H, W) float32
    """
    N, Cin, H, W = x_nchw.shape
    Cout = weight.shape[0]
    HW = H * W
    hw_pad = ((HW + 127) // 128) * 128   # keep stores lane-dense / unmasked

    # Channels-first compute: free reshape, no NCHW<->NHWC transposes.
    x3 = x_nchw.reshape(N, Cin, HW)
    if hw_pad != HW:
        # Pad the spatial axis to a 128-multiple (pad -> compute -> slice) so
        # tiles stay bounded and stores stay unmasked even for odd H*W.
        x3 = jnp.pad(x3, ((0, 0), (0, 0), (0, hw_pad - HW)))
    w_mat = weight.reshape(Cout, Cin)
    b_col = bias.reshape(Cout, 1)
    a_arr = jnp.asarray(alpha, jnp.float32).reshape(1, 1)

    nb, tl = _plan_tiling(N, Cin, Cout, hw_pad)
    grid = (N // nb, hw_pad // tl)   # both independent -> megacore-shardable

    out3 = pl.pallas_call(
        _expanding_kernel,
        out_shape=jax.ShapeDtypeStruct((N, Cout, hw_pad), jnp.float32),
        grid=grid,
        in_specs=[
            # Nb images x spatial tile, channels on sublanes
            pl.BlockSpec((nb, Cin, tl), lambda n, l: (n, 0, l)),
            # weight / bias: constant block index -> fetched once, not per step
            pl.BlockSpec((Cout, Cin), lambda n, l: (0, 0)),
            pl.BlockSpec((Cout, 1), lambda n, l: (0, 0)),
            # PReLU slope lives in SMEM (scalar path)
            pl.BlockSpec((1, 1), lambda n, l: (0, 0),
                         memory_space=pltpu.MemorySpace.SMEM),
        ],
        out_specs=pl.BlockSpec((nb, Cout, tl), lambda n, l: (n, 0, l)),
        compiler_params=pltpu.CompilerParams(
            dimension_semantics=("parallel", "parallel")),
    )(x3, w_mat, b_col, a_arr)

    if hw_pad != HW:
        out3 = out3[:, :, :HW]
    return out3.reshape(N, Cout, H, W)  # free reshape back to NCHW


def _reference(x, weight, bias, alpha):
    Cout, Cin = weight.shape[0], weight.shape[1]
    y = jnp.einsum("nchw,oc->nohw", x, weight.reshape(Cout, Cin)) \
        + bias.reshape(1, Cout, 1, 1)
    return jnp.where(y > 0, y, alpha * y)


if __name__ == "__main__":
    # expanding(out2=4, out1=8): Conv2d(4 -> 8, kernel 1, bias=True) + PReLU
    out2, out1 = 4, 8          # in-channels, out-channels
    N, H, W = 2, 16, 16

    key = jax.random.PRNGKey(0)
    kx, kw, kb = jax.random.split(key, 3)

    x = jax.random.normal(kx, (N, out2, H, W), dtype=jnp.float32)
    weight = jax.random.normal(kw, (out1, out2, 1, 1), dtype=jnp.float32) * 0.1
    bias = jax.random.normal(kb, (out1,), dtype=jnp.float32) * 0.1
    alpha = jnp.float32(0.25)   # nn.PReLU default init

    y = expanding_forward(x, weight, bias, alpha)
    y = jax.block_until_ready(y)
    assert jnp.allclose(y, _reference(x, weight, bias, alpha),
                        atol=1e-5, rtol=1e-5), "mismatch vs reference"

    # also exercise the padded path (H*W not a 128-multiple)
    x2 = jax.random.normal(kx, (3, out2, 5, 6), dtype=jnp.float32)
    y2 = jax.block_until_ready(expanding_forward(x2, weight, bias, alpha))
    assert jnp.allclose(y2, _reference(x2, weight, bias, alpha),
                        atol=1e-5, rtol=1e-5), "mismatch vs reference (padded)"

    print("KERNEL_OK")
</pallas_src>

<mosaic_0001>
module attributes {stable_mosaic.version = 11 : i64} {
  func.func @_expanding_kernel(%arg0: i32, %arg1: i32, %arg2: memref<1x4x256xf32, #tpu.memory_space<vmem>>, %arg3: memref<8x4xf32, #tpu.memory_space<vmem>>, %arg4: memref<8x1xf32, #tpu.memory_space<vmem>>, %arg5: memref<1x1xf32, #tpu.memory_space<smem>>, %arg6: memref<1x8x256xf32, #tpu.memory_space<vmem>>) attributes {dimension_semantics = [#tpu.dimension_semantics<parallel>, #tpu.dimension_semantics<parallel>], iteration_bounds = array<i64: 2, 1>, scalar_prefetch = 0 : i64, scratch_operands = 0 : i64, tpu.core_type = #tpu.core_type<tc>, window_params = [{transform_indices = @transform_0, window_bounds = array<i64: 1, 4, 256>}, {pipeline_mode = #tpu.pipeline_mode<synchronous>, transform_indices = @transform_1, window_bounds = array<i64: 8, 4>}, {pipeline_mode = #tpu.pipeline_mode<synchronous>, transform_indices = @transform_2, window_bounds = array<i64: 8, 1>}, {transform_indices = @transform_3, window_bounds = array<i64: 1, 1>}, {transform_indices = @transform_4, window_bounds = array<i64: 1, 8, 256>}]} {
    %c0 = arith.constant 0 : index
    %c0_0 = arith.constant 0 : index
    %c0_1 = arith.constant 0 : index
    %0 = vector.load %arg2[%c0, %c0_0, %c0_1] : memref<1x4x256xf32, #tpu.memory_space<vmem>>, vector<1x4x256xf32>
    %c0_2 = arith.constant 0 : index
    %c0_3 = arith.constant 0 : index
    %1 = vector.load %arg3[%c0_2, %c0_3] : memref<8x4xf32, #tpu.memory_space<vmem>>, vector<8x4xf32>
    %c0_4 = arith.constant 0 : index
    %c0_5 = arith.constant 0 : index
    %2 = vector.load %arg4[%c0_4, %c0_5] : memref<8x1xf32, #tpu.memory_space<vmem>>, vector<8x1xf32>
    %3 = vector.shape_cast %2 : vector<8x1xf32> to vector<1x8x1xf32>
    %4 = vector.shape_cast %3 : vector<1x8x1xf32> to vector<1x8x1xf32>
    %5 = vector.broadcast %4 : vector<1x8x1xf32> to vector<1x8x256xf32>
    %6 = vector.extract_strided_slice %1 {offsets = [0, 0], sizes = [8, 1], strides = [1, 1]} : vector<8x4xf32> to vector<8x1xf32>
    %7 = vector.shape_cast %6 : vector<8x1xf32> to vector<8xf32>
    %8 = vector.shape_cast %7 : vector<8xf32> to vector<1x8x1xf32>
    %9 = vector.extract_strided_slice %0 {offsets = [0, 0, 0], sizes = [1, 1, 256], strides = [1, 1, 1]} : vector<1x4x256xf32> to vector<1x1x256xf32>
    %10 = vector.shape_cast %9 : vector<1x1x256xf32> to vector<1x256xf32>
    %11 = vector.shape_cast %10 : vector<1x256xf32> to vector<1x1x256xf32>
    %12 = vector.broadcast %8 : vector<1x8x1xf32> to vector<1x8x256xf32>
    %13 = vector.broadcast %11 : vector<1x1x256xf32> to vector<1x8x256xf32>
    %14 = arith.mulf %12, %13 : vector<1x8x256xf32>
    %15 = arith.addf %5, %14 : vector<1x8x256xf32>
    %16 = vector.extract_strided_slice %1 {offsets = [0, 1], sizes = [8, 1], strides = [1, 1]} : vector<8x4xf32> to vector<8x1xf32>
    %17 = vector.shape_cast %16 : vector<8x1xf32> to vector<8xf32>
    %18 = vector.shape_cast %17 : vector<8xf32> to vector<1x8x1xf32>
    %19 = vector.extract_strided_slice %0 {offsets = [0, 1, 0], sizes = [1, 1, 256], strides = [1, 1, 1]} : vector<1x4x256xf32> to vector<1x1x256xf32>
    %20 = vector.shape_cast %19 : vector<1x1x256xf32> to vector<1x256xf32>
    %21 = vector.shape_cast %20 : vector<1x256xf32> to vector<1x1x256xf32>
    %22 = vector.broadcast %18 : vector<1x8x1xf32> to vector<1x8x256xf32>
    %23 = vector.broadcast %21 : vector<1x1x256xf32> to vector<1x8x256xf32>
    %24 = arith.mulf %22, %23 : vector<1x8x256xf32>
    %25 = arith.addf %15, %24 : vector<1x8x256xf32>
    %26 = vector.extract_strided_slice %1 {offsets = [0, 2], sizes = [8, 1], strides = [1, 1]} : vector<8x4xf32> to vector<8x1xf32>
    %27 = vector.shape_cast %26 : vector<8x1xf32> to vector<8xf32>
    %28 = vector.shape_cast %27 : vector<8xf32> to vector<1x8x1xf32>
    %29 = vector.extract_strided_slice %0 {offsets = [0, 2, 0], sizes = [1, 1, 256], strides = [1, 1, 1]} : vector<1x4x256xf32> to vector<1x1x256xf32>
    %30 = vector.shape_cast %29 : vector<1x1x256xf32> to vector<1x256xf32>
    %31 = vector.shape_cast %30 : vector<1x256xf32> to vector<1x1x256xf32>
    %32 = vector.broadcast %28 : vector<1x8x1xf32> to vector<1x8x256xf32>
    %33 = vector.broadcast %31 : vector<1x1x256xf32> to vector<1x8x256xf32>
    %34 = arith.mulf %32, %33 : vector<1x8x256xf32>
    %35 = arith.addf %25, %34 : vector<1x8x256xf32>
    %36 = vector.extract_strided_slice %1 {offsets = [0, 3], sizes = [8, 1], strides = [1, 1]} : vector<8x4xf32> to vector<8x1xf32>
    %37 = vector.shape_cast %36 : vector<8x1xf32> to vector<8xf32>
    %38 = vector.shape_cast %37 : vector<8xf32> to vector<1x8x1xf32>
    %39 = vector.extract_strided_slice %0 {offsets = [0, 3, 0], sizes = [1, 1, 256], strides = [1, 1, 1]} : vector<1x4x256xf32> to vector<1x1x256xf32>
    %40 = vector.shape_cast %39 : vector<1x1x256xf32> to vector<1x256xf32>
    %41 = vector.shape_cast %40 : vector<1x256xf32> to vector<1x1x256xf32>
    %42 = vector.broadcast %38 : vector<1x8x1xf32> to vector<1x8x256xf32>
    %43 = vector.broadcast %41 : vector<1x1x256xf32> to vector<1x8x256xf32>
    %44 = arith.mulf %42, %43 : vector<1x8x256xf32>
    %45 = arith.addf %35, %44 : vector<1x8x256xf32>
    %c0_6 = arith.constant 0 : index
    %c0_7 = arith.constant 0 : index
    %46 = memref.load %arg5[%c0_6, %c0_7] : memref<1x1xf32, #tpu.memory_space<smem>>
    %cst = arith.constant 0.000000e+00 : f32
    %47 = vector.broadcast %cst : f32 to vector<1x8x256xf32>
    %48 = arith.cmpf ogt, %45, %47 : vector<1x8x256xf32>
    %49 = vector.broadcast %46 : f32 to vector<1x8x256xf32>
    %50 = arith.mulf %49, %45 : vector<1x8x256xf32>
    %51 = arith.select %48, %45, %50 : vector<1x8x256xi1>, vector<1x8x256xf32>
    %c0_8 = arith.constant 0 : index
    %c0_9 = arith.constant 0 : index
    %c0_10 = arith.constant 0 : index
    %52 = vector.load %arg6[%c0_8, %c0_9, %c0_10] : memref<1x8x256xf32, #tpu.memory_space<vmem>>, vector<1x8x256xf32>
    tpu.vector_store %arg6[%c0_8, %c0_9, %c0_10], %51 {strides = array<i32>} : memref<1x8x256xf32, #tpu.memory_space<vmem>>, vector<1x8x256xf32>,
    return
  }
  func.func @transform_0(%arg0: i32, %arg1: i32) -> (i32, i32, i32) {
    %c0_i32 = arith.constant 0 : i32
    %c0_i32_0 = arith.constant 0 : i32
    return %arg0, %c0_i32, %arg1 : i32, i32, i32
  }
  func.func @transform_1(%arg0: i32, %arg1: i32) -> (i32, i32) {
    %c0_i32 = arith.constant 0 : i32
    %c0_i32_0 = arith.constant 0 : i32
    %c0_i32_1 = arith.constant 0 : i32
    return %c0_i32, %c0_i32_0 : i32, i32
  }
  func.func @transform_2(%arg0: i32, %arg1: i32) -> (i32, i32) {
    %c0_i32 = arith.constant 0 : i32
    %c0_i32_0 = arith.constant 0 : i32
    %c0_i32_1 = arith.constant 0 : i32
    return %c0_i32, %c0_i32_0 : i32, i32
  }
  func.func @transform_3(%arg0: i32, %arg1: i32) -> (i32, i32) {
    %c0_i32 = arith.constant 0 : i32
    %c0_i32_0 = arith.constant 0 : i32
    %c0_i32_1 = arith.constant 0 : i32
    return %c0_i32, %c0_i32_0 : i32, i32
  }
  func.func @transform_4(%arg0: i32, %arg1: i32) -> (i32, i32, i32) {
    %c0_i32 = arith.constant 0 : i32
    %c0_i32_0 = arith.constant 0 : i32
    return %arg0, %c0_i32, %arg1 : i32, i32, i32
  }
}

</mosaic_0001>

<bundles_post_ra>
// kernel: tpu_custom_call.1
= control target key start
LH: loop header
LB: loop body
LE: loop exit
PB: predicated region body
PF: predicated region fallthrough
CT: control target
= control target key end

     0   :  { %s755_s0 = inlined_call_operand.vmem [shape: f32[2,4,256], index: 0, kind: input, shape index: {}]   ;;  %s756_s1 = inlined_call_operand.vmem [shape: f32[8,4], index: 1, kind: input, shape index: {}]   ;;  %s757_s2 = inlined_call_operand.vmem [shape: f32[8,1], index: 2, kind: input, shape index: {}]   ;;  %s758_s3 = inlined_call_operand.<no memory space> [shape: f32[1,1], index: 3, kind: input, shape index: {}]   ;;  %s759_s4 = inlined_call_operand.hbm [shape: f32[2,8,256], index: 4, kind: output, shape index: {}]  }
   0x1   :  { %9 = sst [smem:[#allocation2]] %s758_s3 }
   0x2   :  { %10 = vsyncpa [#allocation4], 0 }
   0x3   :  { %12 = vsyncpa [#allocation4 + $0x1], 0  ;;  %s634_s17 = smov 0   ;;  %s636_s18 = smov 0  }
   0x4   :  { %s638_s19 = smov 0   ;;  %s640_s20 = smov 0  }
   0x5   :  { %s642_s21 = smov 0   ;;  %s644_s22 = smov 0  }
   0x6 LB: > { %s445_s3 = sadd.s32 4294967295, %s599_s22   ;;  %s446_s23 = sadd.s32 4294967294, %s599_s22   ;;  %s599_s22 = sphi %s644_s22, %s18_s22   ;;  %s595_s21 = sphi %s642_s21, %s766_s21   ;;  %s591_s20 = sphi %s640_s20, %s765_s20   ;;  %s587_s19 = sphi %s638_s19, %s764_s19   ;;  %s583_s18 = sphi %s636_s18, %s763_s18   ;;  %s579_s17 = sphi %s634_s17, %s762_s17  }
   0x7   : > { %s30_s24 = sadd.s32 1, %s595_s21  ;;  %s130_s25 = sadd.s32 1, %s587_s19 }
   0x8   : > { %p32_p0 = scmp.ge.s32.totalorder %s30_s24, 2  ;;  %p140_p1 = scmp.ne.s32.totalorder %s587_s19, %s583_s18 }
   0x9   : > { %p141_p2 = scmp.eq.s32.totalorder %s445_s3, 1  ;;  %p146_p3 = scmp.ne.s32.totalorder %s583_s18, %s579_s17 }
   0xa   : > { %s768_s24 = smov (%p32_p0, %s30_s24), 0  ;;  %p147_p5 = scmp.eq.s32.totalorder %s446_s23, 1 }
   0xb   : > { %p674_p4 = por %p141_p2, %p140_p1  ;;  %s125_s27 = ssub.s32 %s595_s21, %s768_s24 }
   0xc   : > { %p449_p6 = scmp.ge.s32.totalorder %s599_s22, 1  ;;  %p128_p7 = scmp.eq.s32.totalorder %s125_s27, 0 }
   0xd   : > { %p681_p8 = por %p147_p5, %p146_p3  ;;  %p187_p9 = scmp.lt.s32.totalorder %s599_s22, 3 }
   0xe   : > { %s687_s29 = scalar_select %p128_p7, %s587_s19, %s130_s25  }
   0xf   : > { %p188_p10 = pnand %p449_p6, %p187_p9 }
  0x10   : > { %p218_p11 = scmp.lt.s32.totalorder (!%p188_p10), %s591_s20, 1  ;;  %s342_s13 = sld [smem:[#allocation2]] (!%p188_p10) }
  0x11   : > { %191 = sbr.rel (%p188_p10) target bundleno = 177 (0xb1), region = 36  ;;  %s214_s14 = sand.u32 (!%p188_p10), 1, %s583_s18  }
  0x12   : > { %s450_s15 = sshll.u32 (!%p188_p10), %s214_s14, 4  ;;  %s459_s16 = sshll.u32 (!%p188_p10), %s591_s20, 8 }
  0x13   : > { %s216_s3 = scalar_lea.vmem (!%p188_p10), [#allocation3], %s450_s15  ;;  %s707_s30 = scalar_lea.hbm (!%p188_p10), %s759_s4, %s459_s16 }
  0x14   : > { %s369_s23 = sshll.u32 (!%p188_p10), %s216_s3, 4  ;;  %s605_s6 = smov (!%p188_p10), [#allocation3]   ;;  %s709_s23 = int_to_ptr.vmem [resolvable:$true] %s369_s23 }
  0x15   : > { %s523_s5 = scalar_lea.vmem (!%p188_p10), %s709_s23, 256  ;;  %s527_s7 = sshll.u32 (!%p188_p10), %s605_s6, 4  ;;  %s528_s7 = int_to_ptr.vmem [resolvable:$false] %s527_s7 }
  0x16   : > { %v229_v0 = vld [vmem:[%s756_s1] sm:$0xff]  ;;  %v601_v1 = vmov 0   ;;  %v602_v2 = vmov 1   ;;  %v603_v4 = vmov 2   ;;  %v604_v5 = vmov 3   ;;  %s219_s8 = scalar_select %p218_p11, %s591_s20, 1 }
  0x17   : > { %519 = vset.pattern.permute.xlu0 %v601_v1  ;;  %520 = vset.pattern.permute.xlu1 %v602_v2  ;;  %v230_v3 = vld [vmem:[%s757_s2] sm:$0xff]  ;;  %v242_v6 = vlaneseq  ;;  %v345_v52 = vstv %s342_s13  ;;  %s353_s20 = scalar_lea.sflag [#allocation4], %s214_s14  ;;  %p524_p12 = scmp.ne.s32.totalorder %s709_s23, %s523_s5 }
  0x18   : > { %238 = vperm.xlu0 %519, %v229_v0   ;;  %265 = vperm.xlu1 %520, %v229_v0   ;;  %s458_s9 = sshll.u32 %s219_s8, 3  ;;  %s529_s8 = scalar_lea.vmem %s528_s7, 512 }
  0x19   : > { %v243_v7 = vshrl.u32 %v242_v6, 7  ;;  %s225_s12 = scalar_lea.vmem %s755_s0, %s458_s9  ;;  %p525_p13 = pnand %p524_p12, %p674_p4 }
  0x1a   : > { %v228_v10 = vld [vmem:[%s225_s12] sm:$0xff]  ;;  %p530_p1 = scmp.lt.s32.totalorder %s709_s23, %s528_s7  ;;  %p531_p2 = scmp.lt.s32.totalorder %s529_s8, %s523_s5 }
  0x1b   : > { %v244_v8 = vsub.s32 0, %v243_v7  ;;  %v248_v9 = vsub.s32 4, %v243_v7  ;;  %v270_v11 = vsub.s32 1, %v243_v7  ;;  %v274_v12 = vsub.s32 5, %v243_v7  ;;  %p526_p0 = pneg %p525_p13 }
  0x1c   : > { %233 = vperm.xlu0 %519, %v230_v3   ;;  %521 = vset.pattern.permute.xlu1 %v603_v4  ;;  %v296_v13 = vsub.s32 2, %v243_v7  ;;  %v300_v14 = vsub.s32 6, %v243_v7  ;;  %v322_v21 = vsub.s32 3, %v243_v7  ;;  %v326_v22 = vsub.s32 7, %v243_v7  ;;  %p532_p3 = por %p531_p2, %p530_p1 }
  0x1d   : > { %291 = vperm.xlu1 %521, %v229_v0   ;;  %v245_v15 = vrot.slane %v228_v10, %v244_v8  ;;  %v249_v16 = vrot.slane %v228_v10, %v248_v9  ;;  %v271_v17 = vrot.slane %v228_v10, %v270_v11  ;;  %v275_v18 = vrot.slane %v228_v10, %v274_v12 }
  0x1e   : > { %v297_v19 = vrot.slane %v228_v10, %v296_v13  ;;  %v301_v20 = vrot.slane %v228_v10, %v300_v14  ;;  %v323_v31 = vrot.slane %v228_v10, %v322_v21  ;;  %v327_v32 = vrot.slane %v228_v10, %v326_v22  ;;  %p533_p5 = pnand %p532_p3, %p526_p0 }
  0x1f   : > { %v255_v23 = vrot.slane %v245_v15, %v244_v8  ;;  %v259_v24 = vrot.slane %v249_v16, %v244_v8  ;;  %v281_v27 = vrot.slane %v271_v17, %v270_v11  ;;  %v285_v28 = vrot.slane %v275_v18, %v270_v11 }
  0x20   : > { %522 = vset.pattern.permute.xlu0 %v604_v5  ;;  %v307_v29 = vrot.slane %v297_v19, %v296_v13  ;;  %v311_v30 = vrot.slane %v301_v20, %v296_v13  ;;  %v333_v43 = vrot.slane %v323_v31, %v322_v21  ;;  %v337_v44 = vrot.slane %v327_v32, %v322_v21 }
  0x21   : > { %317 = vperm.xlu0 %522, %v229_v0  }
  0x93   : > { %v239_v25 = vpop.permute.xlu0 %238  ;;  %v266_v26 = vpop.permute.xlu1 %265 }
  0x94   : > { %v260_v33 = vmul.f32 %v255_v23, %v239_v25  ;;  %v261_v34 = vmul.f32 %v259_v24, %v239_v25  ;;  %v286_v36 = vmul.f32 %v281_v27, %v266_v26  ;;  %v287_v37 = vmul.f32 %v285_v28, %v266_v26 }
  0x97   : > { %v234_v35 = vpop.permute.xlu0 %233 }
  0x98   : > { %v262_v38 = vadd.f32 %v260_v33, %v234_v35  ;;  %v263_v39 = vadd.f32 %v261_v34, %v234_v35  ;;  %v292_v40 = vpop.permute.xlu1 %291 }
  0x99   : > { %v312_v41 = vmul.f32 %v307_v29, %v292_v40  ;;  %v313_v42 = vmul.f32 %v311_v30, %v292_v40 }
  0x9a   : > { %v288_v45 = vadd.f32 %v286_v36, %v262_v38  ;;  %v289_v46 = vadd.f32 %v287_v37, %v263_v39 }
  0x9c   : > { %v314_v47 = vadd.f32 %v312_v41, %v288_v45  ;;  %v315_v48 = vadd.f32 %v313_v42, %v289_v46  ;;  %v318_v49 = vpop.permute.xlu0 %317 }
  0x9d   : > { %v338_v50 = vmul.f32 %v333_v43, %v318_v49  ;;  %v339_v51 = vmul.f32 %v337_v44, %v318_v49 }
  0x9f   : > { %v340_v53 = vadd.f32 %v338_v50, %v314_v47  ;;  %v341_v54 = vadd.f32 %v339_v51, %v315_v48 }
  0xa1   : > { %vm343_vm0 = vcmp.gt.f32.partialorder %v340_v53, 0.0  ;;  %vm344_vm1 = vcmp.gt.f32.partialorder %v341_v54, 0.0  ;;  %v346_v55 = vmul.f32 %v345_v52, %v340_v53  ;;  %v347_v56 = vmul.f32 %v345_v52, %v341_v54 }
  0xa3   : > { %v348_v57 = vsel %vm343_vm0, %v340_v53, %v346_v55  ;;  %v349_v58 = vsel %vm344_vm1, %v341_v54, %v347_v56 }
  0xa4   : > { %350 = vst [vmem:[%s216_s3] sm:$0xff] %v348_v57  ;;  %351 = vst [vmem:[%s216_s3 + $0x8] sm:$0xff] %v349_v58 }
  0xa5   : > { %536 = shalt.err (!%p533_p5)
}
  0xa6   : > { %s537_s9 = scalar_lea.hbm %s707_s30, 256  ;;  %s541_s12 = scalar_lea.hbm %s759_s4, 512 }
  0xa7   : > { %p538_p6 = scmp.ne.s32.totalorder %s707_s30, %s537_s9  ;;  %p542_p10 = scmp.lt.s32.totalorder %s707_s30, %s759_s4 }
  0xa8   : > { %p543_p11 = scmp.lt.s32.totalorder %s541_s12, %s537_s9 }
  0xa9   : > { %p539_p7 = pnand %p538_p6, %p674_p4 }
  0xaa   : > { %p544_p12 = por %p543_p11, %p542_p10 }
  0xab   : > { %p540_p9 = pneg %p539_p7 }
  0xad   : > { %p545_p13 = pnand %p544_p12, %p540_p9 }
  0xaf   : > { %548 = shalt.err (!%p545_p13)
}
  0xb0   : > { %460 = dma.vmem_to_hbm [thread:$0]  (%p674_p4), %s709_s23, 256, %s707_s30, %s353_s20  }
  0xb1 PF: > { %p466_p0 = scmp.ge.s32.totalorder %s599_s22, 2  ;;  %s381_s15 = sand.u32 1, %s579_s17  }
  0xb2   : > { %s382_s16 = scalar_lea.sflag [#allocation4], %s381_s15 }
  0xb3   : > { %p463_p1 = pnand %p466_p0, %p681_p8 }
  0xb5   : > { %p464_p2 = pneg %p463_p1 }
  0xb7   : > { %574 = dma.done.wait (%p464_p2), %s382_s16, 256  }
  0xb8   : > { %576 = vsyncadd (%p464_p2), %s382_s16, 4294967040  ;;  %s18_s22 = sadd.s32 1, %s599_s22   ;;  %s762_s17 = smov %s583_s18 }
  0xb9   : > { %p15_p3 = scmp.ge.s32.totalorder %s18_s22, 4   ;;  %s763_s18 = smov %s587_s19 }
  0xba   : > { %s764_s19 = smov %s687_s29  ;;  %s765_s20 = smov %s595_s21 }
  0xbb   : > { %s766_s21 = smov %s768_s24  ;;  %17 = sbr.rel (!%p15_p3) target bundleno = 6 (0x6), region = 71 }
  0xc0   :  { %387 = vsyncpa [#allocation4], 1 }
  0xc1   :  { %389 = vsyncpa [#allocation4 + $0x1], 1 }

</bundles_post_ra>
